<compile_context>
chip_gen: v7x
topology: tpu7x:2x2x1
jax: 0.10.0
libtpu: 0.0.40
codegen_flags: <defaults>
</compile_context>

<pallas_src>
import jax
import jax.numpy as jnp
import numpy as np
from jax.experimental import pallas as pl
from jax.experimental.pallas import tpu as pltpu


def _make_vgg_block_kernel(cin, cmid, cout, H, W, pad, bt):
    HW = H * W

    def kernel(x_ref, w1_ref, w2_ref, sh_ref, o_ref,
               xpad_ref, hpad_ref, col1_ref, col2_ref):
        # Column index of every flattened position (for W-direction halo masking).
        col = jax.lax.broadcasted_iota(jnp.int32, (1, HW), 1) % W
        edge_ok = (col >= 1, None, col <= W - 2)      # per-kx validity, kx in {0, 1, 2}

        shift1 = sh_ref[0:cmid, :]                    # (cmid, 1) packed shift vectors
        shift2 = sh_ref[cmid:cmid + cout, :]          # (cout, 1)

        # Zero the halo strips of the padded scratch slabs once per grid step.  The
        # centre stores below never touch the halo, and the grid has <= 2 steps, so this
        # is at most one redundant zeroing per call.  (A program_id==0 guard would be
        # wrong under megacore "parallel" scheduling: each core has its own scratch.)
        for ref, nch in ((xpad_ref, cin), (hpad_ref, cmid)):
            ref[:, :pad] = jnp.zeros((nch, pad), jnp.float32)
            ref[:, pad + HW:] = jnp.zeros((nch, pad), jnp.float32)

        def im2col(src_ref, dst_ref, n_in):
            # Gather the 9 shifted/masked windows into a (9*n_in, HW) slab with
            # lane-aligned stores; the channel contraction then runs as one MXU matmul.
            for ky in range(3):
                for kx in range(3):
                    d = (ky - 1) * W + (kx - 1)
                    xs = src_ref[:, pl.ds(pad + d, HW)]        # (n_in, HW) shifted window
                    if edge_ok[kx] is not None:
                        xs = jnp.where(edge_ok[kx], xs, 0.0)   # mask row-crossing reads
                    t = ky * 3 + kx
                    dst_ref[t * n_in:(t + 1) * n_in, :] = xs

        def conv_bn_relu(src_ref, col_ref, w_ref, shift, n_in):
            im2col(src_ref, col_ref, n_in)
            h = jnp.dot(w_ref[...], col_ref[...],
                        preferred_element_type=jnp.float32)    # single MXU contraction
            return jnp.maximum(h + shift, 0.0)                 # folded bias/BN + ReLU

        for b in range(bt):                                    # bt is small and static
            # conv1 (BN1 scale folded into w1) + shift + ReLU
            xpad_ref[:, pl.ds(pad, HW)] = x_ref[b].astype(jnp.float32)
            h = conv_bn_relu(xpad_ref, col1_ref, w1_ref, shift1, cin)

            # conv2 (BN2 scale folded into w2) + shift + ReLU
            hpad_ref[:, pl.ds(pad, HW)] = h
            h = conv_bn_relu(hpad_ref, col2_ref, w2_ref, shift2, cmid)

            o_ref[b] = h.astype(o_ref.dtype)

    return kernel


def vgg_block_forward(x, params, eps=1e-5, batch_tile=None):
    """Fused VGGBlock forward. x: (B, Cin, H, W) NCHW float32, BatchNorm in eval mode."""
    B, Cin, H, W = x.shape
    HW = H * W
    PAD = 128                      # lane-aligned halo for the flattened window reads
    assert W + 1 <= PAD, "halo must cover a +/-1-row shift in the flattened layout"
    assert H >= 2 and W >= 2

    w1, b1 = params["conv1_w"], params["conv1_b"]
    w2, b2 = params["conv2_w"], params["conv2_b"]
    Cmid, Cout = w1.shape[0], w2.shape[0]

    # Fold conv bias + inference-mode BatchNorm into (a) the conv weights (scale) and
    # (b) a per-channel shift applied in the kernel epilogue.
    scale1 = params["bn1_gamma"] * jax.lax.rsqrt(params["bn1_var"] + eps)
    shift1 = params["bn1_beta"] + (b1 - params["bn1_mean"]) * scale1
    scale2 = params["bn2_gamma"] * jax.lax.rsqrt(params["bn2_var"] + eps)
    shift2 = params["bn2_beta"] + (b2 - params["bn2_mean"]) * scale2

    # Repack the scaled weights as im2col matrices: column index = tap * Cin_prev + ch.
    def pack(w, scale, co, ci):
        w = (w * scale[:, None, None, None]).reshape(co, ci, 9)
        return jnp.transpose(w, (0, 2, 1)).reshape(co, 9 * ci).astype(jnp.float32)

    w1_mat = pack(w1, scale1, Cmid, Cin)               # (Cmid, 9*Cin)
    w2_mat = pack(w2, scale2, Cout, Cmid)              # (Cout, 9*Cmid)
    shifts = jnp.concatenate([shift1, shift2]).reshape(Cmid + Cout, 1).astype(jnp.float32)

    # Batch blocking: at most 2 grid steps (one per TensorCore on v7x); a single fat
    # step otherwise.  Override batch_tile for large batches.
    if batch_tile is None:
        batch_tile = B // 2 if (B >= 2 and B % 2 == 0) else B
    assert B % batch_tile == 0
    num_steps = B // batch_tile

    x_flat = x.reshape(B, Cin, HW)                     # lane-dense last dim (H*W)

    kernel = _make_vgg_block_kernel(Cin, Cmid, Cout, H, W, PAD, batch_tile)
    out_flat = pl.pallas_call(
        kernel,
        out_shape=jax.ShapeDtypeStruct((B, Cout, HW), x.dtype),
        grid=(num_steps,),
        in_specs=[
            pl.BlockSpec((batch_tile, Cin, HW), lambda i: (i, 0, 0)),
            pl.BlockSpec((Cmid, 9 * Cin), lambda i: (0, 0)),
            pl.BlockSpec((Cout, 9 * Cmid), lambda i: (0, 0)),
            pl.BlockSpec((Cmid + Cout, 1), lambda i: (0, 0)),
        ],
        out_specs=pl.BlockSpec((batch_tile, Cout, HW), lambda i: (i, 0, 0)),
        scratch_shapes=[
            pltpu.VMEM((Cin, HW + 2 * PAD), jnp.float32),    # zero-padded input slab
            pltpu.VMEM((Cmid, HW + 2 * PAD), jnp.float32),   # zero-padded hidden slab
            pltpu.VMEM((9 * Cin, HW), jnp.float32),          # im2col for conv1
            pltpu.VMEM((9 * Cmid, HW), jnp.float32),         # im2col for conv2
        ],
        compiler_params=pltpu.CompilerParams(dimension_semantics=("parallel",)),
    )(x_flat, w1_mat, w2_mat, shifts)

    return out_flat.reshape(B, Cout, H, W)


def vgg_block_reference(x, params, eps=1e-5):
    """Pure-JAX reference mirroring the PyTorch VGGBlock forward (BN in eval mode)."""
    def conv_bn_relu(h, w, b, gamma, beta, mean, var):
        h = jax.lax.conv_general_dilated(
            h, w, window_strides=(1, 1), padding=((1, 1), (1, 1)),
            dimension_numbers=("NCHW", "OIHW", "NCHW"),
            precision=jax.lax.Precision.HIGHEST)
        h = h + b[None, :, None, None]
        h = (h - mean[None, :, None, None]) * jax.lax.rsqrt(var[None, :, None, None] + eps)
        h = h * gamma[None, :, None, None] + beta[None, :, None, None]
        return jnp.maximum(h, 0.0)

    h = conv_bn_relu(x, params["conv1_w"], params["conv1_b"], params["bn1_gamma"],
                     params["bn1_beta"], params["bn1_mean"], params["bn1_var"])
    h = conv_bn_relu(h, params["conv2_w"], params["conv2_b"], params["bn2_gamma"],
                     params["bn2_beta"], params["bn2_mean"], params["bn2_var"])
    return h


if __name__ == "__main__":
    key = jax.random.PRNGKey(0)
    keys = jax.random.split(key, 14)

    B, Cin, Cmid, Cout, H, W = 2, 8, 16, 8, 16, 16
    x = jax.random.normal(keys[0], (B, Cin, H, W), dtype=jnp.float32)

    def conv_init(kw, kb, co, ci):
        bound = 1.0 / np.sqrt(ci * 9)
        w = jax.random.uniform(kw, (co, ci, 3, 3), jnp.float32, -bound, bound)
        b = jax.random.uniform(kb, (co,), jnp.float32, -bound, bound)
        return w, b

    w1, b1 = conv_init(keys[1], keys[2], Cmid, Cin)
    w2, b2 = conv_init(keys[3], keys[4], Cout, Cmid)

    params = {
        "conv1_w": w1, "conv1_b": b1,
        "bn1_gamma": jax.random.uniform(keys[5], (Cmid,), jnp.float32, 0.5, 1.5),
        "bn1_beta": jax.random.normal(keys[6], (Cmid,), jnp.float32) * 0.1,
        "bn1_mean": jax.random.normal(keys[7], (Cmid,), jnp.float32) * 0.1,
        "bn1_var": jax.random.uniform(keys[8], (Cmid,), jnp.float32, 0.5, 1.5),
        "conv2_w": w2, "conv2_b": b2,
        "bn2_gamma": jax.random.uniform(keys[9], (Cout,), jnp.float32, 0.5, 1.5),
        "bn2_beta": jax.random.normal(keys[10], (Cout,), jnp.float32) * 0.1,
        "bn2_mean": jax.random.normal(keys[11], (Cout,), jnp.float32) * 0.1,
        "bn2_var": jax.random.uniform(keys[12], (Cout,), jnp.float32, 0.5, 1.5),
    }

    fwd = jax.jit(vgg_block_forward)
    out = fwd(x, params)
    out = jax.block_until_ready(out)

    ref = vgg_block_reference(x, params)
    # preferred_element_type=f32 guarantees f32 accumulation; the tolerance leaves
    # headroom in case the backend lowers the f32 operands of the MXU contraction via
    # bf16 passes (structural bugs would produce errors orders of magnitude larger).
    np.testing.assert_allclose(np.asarray(out), np.asarray(ref), rtol=2e-2, atol=2e-2)
    print("KERNEL_OK")
</pallas_src>

<mosaic_0001>
module attributes {stable_mosaic.version = 11 : i64} {
  func.func @kernel(%arg0: i32, %arg1: memref<1x8x256xf32, #tpu.memory_space<vmem>>, %arg2: memref<16x72xf32, #tpu.memory_space<vmem>>, %arg3: memref<8x144xf32, #tpu.memory_space<vmem>>, %arg4: memref<24x1xf32, #tpu.memory_space<vmem>>, %arg5: memref<1x8x256xf32, #tpu.memory_space<vmem>>, %arg6: memref<8x512xf32, #tpu.memory_space<vmem>>, %arg7: memref<16x512xf32, #tpu.memory_space<vmem>>, %arg8: memref<72x256xf32, #tpu.memory_space<vmem>>, %arg9: memref<144x256xf32, #tpu.memory_space<vmem>>) attributes {dimension_semantics = [#tpu.dimension_semantics<parallel>], iteration_bounds = array<i64: 2>, scalar_prefetch = 0 : i64, scratch_operands = 4 : i64, tpu.core_type = #tpu.core_type<tc>, window_params = [{transform_indices = @transform_0, window_bounds = array<i64: 1, 8, 256>}, {pipeline_mode = #tpu.pipeline_mode<synchronous>, transform_indices = @transform_1, window_bounds = array<i64: 16, 72>}, {pipeline_mode = #tpu.pipeline_mode<synchronous>, transform_indices = @transform_2, window_bounds = array<i64: 8, 144>}, {pipeline_mode = #tpu.pipeline_mode<synchronous>, transform_indices = @transform_3, window_bounds = array<i64: 24, 1>}, {transform_indices = @transform_4, window_bounds = array<i64: 1, 8, 256>}]} {
    %0 = tpu.iota {dimensions = array<i32: 1>} : vector<1x256xi32>
    %c16_i32 = arith.constant 16 : i32
    %c0_i32 = arith.constant 0 : i32
    %1 = arith.cmpi eq, %c16_i32, %c0_i32 : i32
    %c1_i32 = arith.constant 1 : i32
    %2 = arith.select %1, %c1_i32, %c16_i32 : i32
    %3 = vector.broadcast %2 : i32 to vector<1x256xi32>
    %4 = arith.remsi %0, %3 : vector<1x256xi32>
    %c0_i32_0 = arith.constant 0 : i32
    %5 = vector.broadcast %c0_i32_0 : i32 to vector<1x256xi32>
    %6 = arith.cmpi ne, %4, %5 : vector<1x256xi32>
    %c0_i32_1 = arith.constant 0 : i32
    %7 = vector.broadcast %c0_i32_1 : i32 to vector<1x256xi32>
    %8 = arith.cmpi slt, %4, %7 : vector<1x256xi32>
    %c0_i32_2 = arith.constant 0 : i32
    %9 = arith.cmpi slt, %2, %c0_i32_2 : i32
    %10 = vector.broadcast %9 : i1 to vector<1x256xi1>
    %11 = vector.broadcast %10 : vector<1x256xi1> to vector<1x256xi1>
    %12 = arith.xori %8, %11 : vector<1x256xi1>
    %13 = arith.andi %12, %6 : vector<1x256xi1>
    %14 = vector.broadcast %2 : i32 to vector<1x256xi32>
    %15 = arith.addi %4, %14 : vector<1x256xi32>
    %16 = arith.select %13, %15, %4 : vector<1x256xi1>, vector<1x256xi32>
    %c1_i32_3 = arith.constant 1 : i32
    %17 = vector.broadcast %c1_i32_3 : i32 to vector<1x256xi32>
    %18 = arith.cmpi sge, %16, %17 : vector<1x256xi32>
    %c14_i32 = arith.constant 14 : i32
    %19 = vector.broadcast %c14_i32 : i32 to vector<1x256xi32>
    %20 = arith.cmpi sle, %16, %19 : vector<1x256xi32>
    %c0 = arith.constant 0 : index
    %c0_4 = arith.constant 0 : index
    %21 = vector.load %arg4[%c0, %c0_4] : memref<24x1xf32, #tpu.memory_space<vmem>>, vector<16x1xf32>
    %c16 = arith.constant 16 : index
    %c0_5 = arith.constant 0 : index
    %22 = vector.load %arg4[%c16, %c0_5] : memref<24x1xf32, #tpu.memory_space<vmem>>, vector<8x1xf32>
    %cst = arith.constant 0.000000e+00 : f32
    %23 = vector.broadcast %cst : f32 to vector<8x128xf32>
    %c0_6 = arith.constant 0 : index
    %c0_7 = arith.constant 0 : index
    %24 = vector.load %arg6[%c0_6, %c0_7] : memref<8x512xf32, #tpu.memory_space<vmem>>, vector<8x128xf32>
    tpu.vector_store %arg6[%c0_6, %c0_7], %23 {strides = array<i32>} : memref<8x512xf32, #tpu.memory_space<vmem>>, vector<8x128xf32>,
    %cst_8 = arith.constant 0.000000e+00 : f32
    %25 = vector.broadcast %cst_8 : f32 to vector<8x128xf32>
    %c0_9 = arith.constant 0 : index
    %c384 = arith.constant 384 : index
    %26 = vector.load %arg6[%c0_9, %c384] : memref<8x512xf32, #tpu.memory_space<vmem>>, vector<8x128xf32>
    tpu.vector_store %arg6[%c0_9, %c384], %25 {strides = array<i32>} : memref<8x512xf32, #tpu.memory_space<vmem>>, vector<8x128xf32>,
    %cst_10 = arith.constant 0.000000e+00 : f32
    %27 = vector.broadcast %cst_10 : f32 to vector<16x128xf32>
    %c0_11 = arith.constant 0 : index
    %c0_12 = arith.constant 0 : index
    %28 = vector.load %arg7[%c0_11, %c0_12] : memref<16x512xf32, #tpu.memory_space<vmem>>, vector<16x128xf32>
    tpu.vector_store %arg7[%c0_11, %c0_12], %27 {strides = array<i32>} : memref<16x512xf32, #tpu.memory_space<vmem>>, vector<16x128xf32>,
    %cst_13 = arith.constant 0.000000e+00 : f32
    %29 = vector.broadcast %cst_13 : f32 to vector<16x128xf32>
    %c0_14 = arith.constant 0 : index
    %c384_15 = arith.constant 384 : index
    %30 = vector.load %arg7[%c0_14, %c384_15] : memref<16x512xf32, #tpu.memory_space<vmem>>, vector<16x128xf32>
    tpu.vector_store %arg7[%c0_14, %c384_15], %29 {strides = array<i32>} : memref<16x512xf32, #tpu.memory_space<vmem>>, vector<16x128xf32>,
    %c0_16 = arith.constant 0 : index
    %c0_17 = arith.constant 0 : index
    %c0_18 = arith.constant 0 : index
    %31 = vector.load %arg1[%c0_16, %c0_17, %c0_18] : memref<1x8x256xf32, #tpu.memory_space<vmem>>, vector<1x8x256xf32>
    %32 = vector.shape_cast %31 : vector<1x8x256xf32> to vector<8x256xf32>
    %c0_19 = arith.constant 0 : index
    %c128 = arith.constant 128 : index
    %33 = vector.load %arg6[%c0_19, %c128] : memref<8x512xf32, #tpu.memory_space<vmem>>, vector<8x256xf32>
    tpu.vector_store %arg6[%c0_19, %c128], %32 {strides = array<i32>} : memref<8x512xf32, #tpu.memory_space<vmem>>, vector<8x256xf32>,
    %c0_20 = arith.constant 0 : index
    %c111 = arith.constant 111 : index
    %34 = vector.load %arg6[%c0_20, %c111] : memref<8x512xf32, #tpu.memory_space<vmem>>, vector<8x256xf32>
    %cst_21 = arith.constant 0.000000e+00 : f32
    %35 = vector.shape_cast %18 : vector<1x256xi1> to vector<1x256xi1>
    %36 = vector.broadcast %35 : vector<1x256xi1> to vector<8x256xi1>
    %37 = vector.broadcast %cst_21 : f32 to vector<8x256xf32>
    %38 = arith.select %36, %34, %37 : vector<8x256xi1>, vector<8x256xf32>
    %c0_22 = arith.constant 0 : index
    %c0_23 = arith.constant 0 : index
    %39 = vector.load %arg8[%c0_22, %c0_23] : memref<72x256xf32, #tpu.memory_space<vmem>>, vector<8x256xf32>
    tpu.vector_store %arg8[%c0_22, %c0_23], %38 {strides = array<i32>} : memref<72x256xf32, #tpu.memory_space<vmem>>, vector<8x256xf32>,
    %c0_24 = arith.constant 0 : index
    %c112 = arith.constant 112 : index
    %40 = vector.load %arg6[%c0_24, %c112] : memref<8x512xf32, #tpu.memory_space<vmem>>, vector<8x256xf32>
    %c8 = arith.constant 8 : index
    %c0_25 = arith.constant 0 : index
    %41 = vector.load %arg8[%c8, %c0_25] : memref<72x256xf32, #tpu.memory_space<vmem>>, vector<8x256xf32>
    tpu.vector_store %arg8[%c8, %c0_25], %40 {strides = array<i32>} : memref<72x256xf32, #tpu.memory_space<vmem>>, vector<8x256xf32>,
    %c0_26 = arith.constant 0 : index
    %c113 = arith.constant 113 : index
    %42 = vector.load %arg6[%c0_26, %c113] : memref<8x512xf32, #tpu.memory_space<vmem>>, vector<8x256xf32>
    %cst_27 = arith.constant 0.000000e+00 : f32
    %43 = vector.shape_cast %20 : vector<1x256xi1> to vector<1x256xi1>
    %44 = vector.broadcast %43 : vector<1x256xi1> to vector<8x256xi1>
    %45 = vector.broadcast %cst_27 : f32 to vector<8x256xf32>
    %46 = arith.select %44, %42, %45 : vector<8x256xi1>, vector<8x256xf32>
    %c16_28 = arith.constant 16 : index
    %c0_29 = arith.constant 0 : index
    %47 = vector.load %arg8[%c16_28, %c0_29] : memref<72x256xf32, #tpu.memory_space<vmem>>, vector<8x256xf32>
    tpu.vector_store %arg8[%c16_28, %c0_29], %46 {strides = array<i32>} : memref<72x256xf32, #tpu.memory_space<vmem>>, vector<8x256xf32>,
    %c0_30 = arith.constant 0 : index
    %c127 = arith.constant 127 : index
    %48 = vector.load %arg6[%c0_30, %c127] : memref<8x512xf32, #tpu.memory_space<vmem>>, vector<8x256xf32>
    %cst_31 = arith.constant 0.000000e+00 : f32
    %49 = vector.shape_cast %18 : vector<1x256xi1> to vector<1x256xi1>
    %50 = vector.broadcast %49 : vector<1x256xi1> to vector<8x256xi1>
    %51 = vector.broadcast %cst_31 : f32 to vector<8x256xf32>
    %52 = arith.select %50, %48, %51 : vector<8x256xi1>, vector<8x256xf32>
    %c24 = arith.constant 24 : index
    %c0_32 = arith.constant 0 : index
    %53 = vector.load %arg8[%c24, %c0_32] : memref<72x256xf32, #tpu.memory_space<vmem>>, vector<8x256xf32>
    tpu.vector_store %arg8[%c24, %c0_32], %52 {strides = array<i32>} : memref<72x256xf32, #tpu.memory_space<vmem>>, vector<8x256xf32>,
    %c0_33 = arith.constant 0 : index
    %c128_34 = arith.constant 128 : index
    %54 = vector.load %arg6[%c0_33, %c128_34] : memref<8x512xf32, #tpu.memory_space<vmem>>, vector<8x256xf32>
    %c32 = arith.constant 32 : index
    %c0_35 = arith.constant 0 : index
    %55 = vector.load %arg8[%c32, %c0_35] : memref<72x256xf32, #tpu.memory_space<vmem>>, vector<8x256xf32>
    tpu.vector_store %arg8[%c32, %c0_35], %54 {strides = array<i32>} : memref<72x256xf32, #tpu.memory_space<vmem>>, vector<8x256xf32>,
    %c0_36 = arith.constant 0 : index
    %c129 = arith.constant 129 : index
    %56 = vector.load %arg6[%c0_36, %c129] : memref<8x512xf32, #tpu.memory_space<vmem>>, vector<8x256xf32>
    %cst_37 = arith.constant 0.000000e+00 : f32
    %57 = vector.shape_cast %20 : vector<1x256xi1> to vector<1x256xi1>
    %58 = vector.broadcast %57 : vector<1x256xi1> to vector<8x256xi1>
    %59 = vector.broadcast %cst_37 : f32 to vector<8x256xf32>
    %60 = arith.select %58, %56, %59 : vector<8x256xi1>, vector<8x256xf32>
    %c40 = arith.constant 40 : index
    %c0_38 = arith.constant 0 : index
    %61 = vector.load %arg8[%c40, %c0_38] : memref<72x256xf32, #tpu.memory_space<vmem>>, vector<8x256xf32>
    tpu.vector_store %arg8[%c40, %c0_38], %60 {strides = array<i32>} : memref<72x256xf32, #tpu.memory_space<vmem>>, vector<8x256xf32>,
    %c0_39 = arith.constant 0 : index
    %c143 = arith.constant 143 : index
    %62 = vector.load %arg6[%c0_39, %c143] : memref<8x512xf32, #tpu.memory_space<vmem>>, vector<8x256xf32>
    %cst_40 = arith.constant 0.000000e+00 : f32
    %63 = vector.shape_cast %18 : vector<1x256xi1> to vector<1x256xi1>
    %64 = vector.broadcast %63 : vector<1x256xi1> to vector<8x256xi1>
    %65 = vector.broadcast %cst_40 : f32 to vector<8x256xf32>
    %66 = arith.select %64, %62, %65 : vector<8x256xi1>, vector<8x256xf32>
    %c48 = arith.constant 48 : index
    %c0_41 = arith.constant 0 : index
    %67 = vector.load %arg8[%c48, %c0_41] : memref<72x256xf32, #tpu.memory_space<vmem>>, vector<8x256xf32>
    tpu.vector_store %arg8[%c48, %c0_41], %66 {strides = array<i32>} : memref<72x256xf32, #tpu.memory_space<vmem>>, vector<8x256xf32>,
    %c0_42 = arith.constant 0 : index
    %c144 = arith.constant 144 : index
    %68 = vector.load %arg6[%c0_42, %c144] : memref<8x512xf32, #tpu.memory_space<vmem>>, vector<8x256xf32>
    %c56 = arith.constant 56 : index
    %c0_43 = arith.constant 0 : index
    %69 = vector.load %arg8[%c56, %c0_43] : memref<72x256xf32, #tpu.memory_space<vmem>>, vector<8x256xf32>
    tpu.vector_store %arg8[%c56, %c0_43], %68 {strides = array<i32>} : memref<72x256xf32, #tpu.memory_space<vmem>>, vector<8x256xf32>,
    %c0_44 = arith.constant 0 : index
    %c145 = arith.constant 145 : index
    %70 = vector.load %arg6[%c0_44, %c145] : memref<8x512xf32, #tpu.memory_space<vmem>>, vector<8x256xf32>
    %cst_45 = arith.constant 0.000000e+00 : f32
    %71 = vector.shape_cast %20 : vector<1x256xi1> to vector<1x256xi1>
    %72 = vector.broadcast %71 : vector<1x256xi1> to vector<8x256xi1>
    %73 = vector.broadcast %cst_45 : f32 to vector<8x256xf32>
    %74 = arith.select %72, %70, %73 : vector<8x256xi1>, vector<8x256xf32>
    %c64 = arith.constant 64 : index
    %c0_46 = arith.constant 0 : index
    %75 = vector.load %arg8[%c64, %c0_46] : memref<72x256xf32, #tpu.memory_space<vmem>>, vector<8x256xf32>
    tpu.vector_store %arg8[%c64, %c0_46], %74 {strides = array<i32>} : memref<72x256xf32, #tpu.memory_space<vmem>>, vector<8x256xf32>,
    %c0_47 = arith.constant 0 : index
    %c0_48 = arith.constant 0 : index
    %76 = vector.load %arg2[%c0_47, %c0_48] : memref<16x72xf32, #tpu.memory_space<vmem>>, vector<16x72xf32>
    %c0_49 = arith.constant 0 : index
    %c0_50 = arith.constant 0 : index
    %77 = vector.load %arg8[%c0_49, %c0_50] : memref<72x256xf32, #tpu.memory_space<vmem>>, vector<72x256xf32>
    %cst_51 = arith.constant dense<0.000000e+00> : vector<16x256xf32>
    %78 = tpu.matmul %76, %77, %cst_51 {dimension_numbers = #tpu.dot_dimension_numbers<[1], [0], [0], [1], [0, 0, 1, 1], [], []>} : vector<16x72xf32>, vector<72x256xf32>, vector<16x256xf32> -> vector<16x256xf32>
    %79 = vector.broadcast %21 : vector<16x1xf32> to vector<16x256xf32>
    %80 = arith.addf %78, %79 : vector<16x256xf32>
    %cst_52 = arith.constant 0.000000e+00 : f32
    %81 = vector.broadcast %cst_52 : f32 to vector<16x256xf32>
    %82 = arith.maximumf %80, %81 : vector<16x256xf32>
    %c0_53 = arith.constant 0 : index
    %c128_54 = arith.constant 128 : index
    %83 = vector.load %arg7[%c0_53, %c128_54] : memref<16x512xf32, #tpu.memory_space<vmem>>, vector<16x256xf32>
    tpu.vector_store %arg7[%c0_53, %c128_54], %82 {strides = array<i32>} : memref<16x512xf32, #tpu.memory_space<vmem>>, vector<16x256xf32>,
    %c0_55 = arith.constant 0 : index
    %c111_56 = arith.constant 111 : index
    %84 = vector.load %arg7[%c0_55, %c111_56] : memref<16x512xf32, #tpu.memory_space<vmem>>, vector<16x256xf32>
    %cst_57 = arith.constant 0.000000e+00 : f32
    %85 = vector.shape_cast %18 : vector<1x256xi1> to vector<1x256xi1>
    %86 = vector.broadcast %85 : vector<1x256xi1> to vector<16x256xi1>
    %87 = vector.broadcast %cst_57 : f32 to vector<16x256xf32>
    %88 = arith.select %86, %84, %87 : vector<16x256xi1>, vector<16x256xf32>
    %c0_58 = arith.constant 0 : index
    %c0_59 = arith.constant 0 : index
    %89 = vector.load %arg9[%c0_58, %c0_59] : memref<144x256xf32, #tpu.memory_space<vmem>>, vector<16x256xf32>
    tpu.vector_store %arg9[%c0_58, %c0_59], %88 {strides = array<i32>} : memref<144x256xf32, #tpu.memory_space<vmem>>, vector<16x256xf32>,
    %c0_60 = arith.constant 0 : index
    %c112_61 = arith.constant 112 : index
    %90 = vector.load %arg7[%c0_60, %c112_61] : memref<16x512xf32, #tpu.memory_space<vmem>>, vector<16x256xf32>
    %c16_62 = arith.constant 16 : index
    %c0_63 = arith.constant 0 : index
    %91 = vector.load %arg9[%c16_62, %c0_63] : memref<144x256xf32, #tpu.memory_space<vmem>>, vector<16x256xf32>
    tpu.vector_store %arg9[%c16_62, %c0_63], %90 {strides = array<i32>} : memref<144x256xf32, #tpu.memory_space<vmem>>, vector<16x256xf32>,
    %c0_64 = arith.constant 0 : index
    %c113_65 = arith.constant 113 : index
    %92 = vector.load %arg7[%c0_64, %c113_65] : memref<16x512xf32, #tpu.memory_space<vmem>>, vector<16x256xf32>
    %cst_66 = arith.constant 0.000000e+00 : f32
    %93 = vector.shape_cast %20 : vector<1x256xi1> to vector<1x256xi1>
    %94 = vector.broadcast %93 : vector<1x256xi1> to vector<16x256xi1>
    %95 = vector.broadcast %cst_66 : f32 to vector<16x256xf32>
    %96 = arith.select %94, %92, %95 : vector<16x256xi1>, vector<16x256xf32>
    %c32_67 = arith.constant 32 : index
    %c0_68 = arith.constant 0 : index
    %97 = vector.load %arg9[%c32_67, %c0_68] : memref<144x256xf32, #tpu.memory_space<vmem>>, vector<16x256xf32>
    tpu.vector_store %arg9[%c32_67, %c0_68], %96 {strides = array<i32>} : memref<144x256xf32, #tpu.memory_space<vmem>>, vector<16x256xf32>,
    %c0_69 = arith.constant 0 : index
    %c127_70 = arith.constant 127 : index
    %98 = vector.load %arg7[%c0_69, %c127_70] : memref<16x512xf32, #tpu.memory_space<vmem>>, vector<16x256xf32>
    %cst_71 = arith.constant 0.000000e+00 : f32
    %99 = vector.shape_cast %18 : vector<1x256xi1> to vector<1x256xi1>
    %100 = vector.broadcast %99 : vector<1x256xi1> to vector<16x256xi1>
    %101 = vector.broadcast %cst_71 : f32 to vector<16x256xf32>
    %102 = arith.select %100, %98, %101 : vector<16x256xi1>, vector<16x256xf32>
    %c48_72 = arith.constant 48 : index
    %c0_73 = arith.constant 0 : index
    %103 = vector.load %arg9[%c48_72, %c0_73] : memref<144x256xf32, #tpu.memory_space<vmem>>, vector<16x256xf32>
    tpu.vector_store %arg9[%c48_72, %c0_73], %102 {strides = array<i32>} : memref<144x256xf32, #tpu.memory_space<vmem>>, vector<16x256xf32>,
    %c0_74 = arith.constant 0 : index
    %c128_75 = arith.constant 128 : index
    %104 = vector.load %arg7[%c0_74, %c128_75] : memref<16x512xf32, #tpu.memory_space<vmem>>, vector<16x256xf32>
    %c64_76 = arith.constant 64 : index
    %c0_77 = arith.constant 0 : index
    %105 = vector.load %arg9[%c64_76, %c0_77] : memref<144x256xf32, #tpu.memory_space<vmem>>, vector<16x256xf32>
    tpu.vector_store %arg9[%c64_76, %c0_77], %104 {strides = array<i32>} : memref<144x256xf32, #tpu.memory_space<vmem>>, vector<16x256xf32>,
    %c0_78 = arith.constant 0 : index
    %c129_79 = arith.constant 129 : index
    %106 = vector.load %arg7[%c0_78, %c129_79] : memref<16x512xf32, #tpu.memory_space<vmem>>, vector<16x256xf32>
    %cst_80 = arith.constant 0.000000e+00 : f32
    %107 = vector.shape_cast %20 : vector<1x256xi1> to vector<1x256xi1>
    %108 = vector.broadcast %107 : vector<1x256xi1> to vector<16x256xi1>
    %109 = vector.broadcast %cst_80 : f32 to vector<16x256xf32>
    %110 = arith.select %108, %106, %109 : vector<16x256xi1>, vector<16x256xf32>
    %c80 = arith.constant 80 : index
    %c0_81 = arith.constant 0 : index
    %111 = vector.load %arg9[%c80, %c0_81] : memref<144x256xf32, #tpu.memory_space<vmem>>, vector<16x256xf32>
    tpu.vector_store %arg9[%c80, %c0_81], %110 {strides = array<i32>} : memref<144x256xf32, #tpu.memory_space<vmem>>, vector<16x256xf32>,
    %c0_82 = arith.constant 0 : index
    %c143_83 = arith.constant 143 : index
    %112 = vector.load %arg7[%c0_82, %c143_83] : memref<16x512xf32, #tpu.memory_space<vmem>>, vector<16x256xf32>
    %cst_84 = arith.constant 0.000000e+00 : f32
    %113 = vector.shape_cast %18 : vector<1x256xi1> to vector<1x256xi1>
    %114 = vector.broadcast %113 : vector<1x256xi1> to vector<16x256xi1>
    %115 = vector.broadcast %cst_84 : f32 to vector<16x256xf32>
    %116 = arith.select %114, %112, %115 : vector<16x256xi1>, vector<16x256xf32>
    %c96 = arith.constant 96 : index
    %c0_85 = arith.constant 0 : index
    %117 = vector.load %arg9[%c96, %c0_85] : memref<144x256xf32, #tpu.memory_space<vmem>>, vector<16x256xf32>
    tpu.vector_store %arg9[%c96, %c0_85], %116 {strides = array<i32>} : memref<144x256xf32, #tpu.memory_space<vmem>>, vector<16x256xf32>,
    %c0_86 = arith.constant 0 : index
    %c144_87 = arith.constant 144 : index
    %118 = vector.load %arg7[%c0_86, %c144_87] : memref<16x512xf32, #tpu.memory_space<vmem>>, vector<16x256xf32>
    %c112_88 = arith.constant 112 : index
    %c0_89 = arith.constant 0 : index
    %119 = vector.load %arg9[%c112_88, %c0_89] : memref<144x256xf32, #tpu.memory_space<vmem>>, vector<16x256xf32>
    tpu.vector_store %arg9[%c112_88, %c0_89], %118 {strides = array<i32>} : memref<144x256xf32, #tpu.memory_space<vmem>>, vector<16x256xf32>,
    %c0_90 = arith.constant 0 : index
    %c145_91 = arith.constant 145 : index
    %120 = vector.load %arg7[%c0_90, %c145_91] : memref<16x512xf32, #tpu.memory_space<vmem>>, vector<16x256xf32>
    %cst_92 = arith.constant 0.000000e+00 : f32
    %121 = vector.shape_cast %20 : vector<1x256xi1> to vector<1x256xi1>
    %122 = vector.broadcast %121 : vector<1x256xi1> to vector<16x256xi1>
    %123 = vector.broadcast %cst_92 : f32 to vector<16x256xf32>
    %124 = arith.select %122, %120, %123 : vector<16x256xi1>, vector<16x256xf32>
    %c128_93 = arith.constant 128 : index
    %c0_94 = arith.constant 0 : index
    %125 = vector.load %arg9[%c128_93, %c0_94] : memref<144x256xf32, #tpu.memory_space<vmem>>, vector<16x256xf32>
    tpu.vector_store %arg9[%c128_93, %c0_94], %124 {strides = array<i32>} : memref<144x256xf32, #tpu.memory_space<vmem>>, vector<16x256xf32>,
    %c0_95 = arith.constant 0 : index
    %c0_96 = arith.constant 0 : index
    %126 = vector.load %arg3[%c0_95, %c0_96] : memref<8x144xf32, #tpu.memory_space<vmem>>, vector<8x144xf32>
    %c0_97 = arith.constant 0 : index
    %c0_98 = arith.constant 0 : index
    %127 = vector.load %arg9[%c0_97, %c0_98] : memref<144x256xf32, #tpu.memory_space<vmem>>, vector<144x256xf32>
    %cst_99 = arith.constant dense<0.000000e+00> : vector<8x256xf32>
    %128 = tpu.matmul %126, %127, %cst_99 {dimension_numbers = #tpu.dot_dimension_numbers<[1], [0], [0], [1], [0, 0, 1, 1], [], []>} : vector<8x144xf32>, vector<144x256xf32>, vector<8x256xf32> -> vector<8x256xf32>
    %129 = vector.broadcast %22 : vector<8x1xf32> to vector<8x256xf32>
    %130 = arith.addf %128, %129 : vector<8x256xf32>
    %cst_100 = arith.constant 0.000000e+00 : f32
    %131 = vector.broadcast %cst_100 : f32 to vector<8x256xf32>
    %132 = arith.maximumf %130, %131 : vector<8x256xf32>
    %c0_101 = arith.constant 0 : index
    %c0_102 = arith.constant 0 : index
    %c0_103 = arith.constant 0 : index
    %133 = vector.load %arg5[%c0_101, %c0_102, %c0_103] : memref<1x8x256xf32, #tpu.memory_space<vmem>>, vector<1x8x256xf32>
    %134 = vector.shape_cast %133 : vector<1x8x256xf32> to vector<8x256xf32>
    %135 = vector.shape_cast %132 : vector<8x256xf32> to vector<1x8x256xf32>
    tpu.vector_store %arg5[%c0_101, %c0_102, %c0_103], %135 {strides = array<i32>} : memref<1x8x256xf32, #tpu.memory_space<vmem>>, vector<1x8x256xf32>,
    return
  }
  func.func @transform_0(%arg0: i32) -> (i32, i32, i32) {
    %c0_i32 = arith.constant 0 : i32
    %c0_i32_0 = arith.constant 0 : i32
    %c0_i32_1 = arith.constant 0 : i32
    return %arg0, %c0_i32, %c0_i32_0 : i32, i32, i32
  }
  func.func @transform_1(%arg0: i32) -> (i32, i32) {
    %c0_i32 = arith.constant 0 : i32
    %c0_i32_0 = arith.constant 0 : i32
    %c0_i32_1 = arith.constant 0 : i32
    return %c0_i32, %c0_i32_0 : i32, i32
  }
  func.func @transform_2(%arg0: i32) -> (i32, i32) {
    %c0_i32 = arith.constant 0 : i32
    %c0_i32_0 = arith.constant 0 : i32
    %c0_i32_1 = arith.constant 0 : i32
    return %c0_i32, %c0_i32_0 : i32, i32
  }
  func.func @transform_3(%arg0: i32) -> (i32, i32) {
    %c0_i32 = arith.constant 0 : i32
    %c0_i32_0 = arith.constant 0 : i32
    %c0_i32_1 = arith.constant 0 : i32
    return %c0_i32, %c0_i32_0 : i32, i32
  }
  func.func @transform_4(%arg0: i32) -> (i32, i32, i32) {
    %c0_i32 = arith.constant 0 : i32
    %c0_i32_0 = arith.constant 0 : i32
    %c0_i32_1 = arith.constant 0 : i32
    return %arg0, %c0_i32, %c0_i32_0 : i32, i32, i32
  }
}

</mosaic_0001>

<bundles_post_ra>
// kernel: vgg_block_forward.1
= control target key start
LH: loop header
LB: loop body
LE: loop exit
PB: predicated region body
PF: predicated region fallthrough
CT: control target
= control target key end

     0   :  { %s1380_s15 = smov 0   ;;  %s1681_s0 = inlined_call_operand.vmem [shape: f32[2,8,256], index: 0, kind: input, shape index: {}]   ;;  %s1682_s1 = inlined_call_operand.vmem [shape: f32[16,72], index: 1, kind: input, shape index: {}]   ;;  %s1683_s2 = inlined_call_operand.vmem [shape: f32[8,144], index: 2, kind: input, shape index: {}]   ;;  %s1684_s3 = inlined_call_operand.vmem [shape: f32[24,1], index: 3, kind: input, shape index: {}]   ;;  %s1685_s4 = inlined_call_operand.vmem [shape: f32[2,8,256], index: 4, kind: output, shape index: {}]  }
   0x1 LB: > { %s1036_s16 = sadd.s32 4294967295, %s1342_s15   ;;  %p1040_p0 = scmp.ge.s32.totalorder %s1342_s15, 1  ;;  %s1342_s15 = sphi %s1380_s15, %s14_s15  }
   0x2   : > { %p162_p1 = scmp.lt.s32.totalorder %s1342_s15, 3 }
   0x4   : > { %p163_p2 = pnand %p1040_p0, %p162_p1 }
   0x5   : > { %p188_p3 = scmp.lt.s32.totalorder (!%p163_p2), %s1036_s16, 1  ;;  %v1344_v0 = vmov (!%p163_p2), 0.0   ;;  %s1345_s17 = smov (!%p163_p2), 17   ;;  %v229_v5 = vld [vmem:[%s1684_s3] sm:$0xff] (!%p163_p2)  ;;  %v1353_v6 = vmov (!%p163_p2), 0   ;;  %v230_v7 = vld [vmem:[%s1684_s3 + $0x8] sm:$0xff] (!%p163_p2)  ;;  %v198_v8 = vlaneseq (!%p163_p2) }
   0x6   : > { %166 = sbr.rel (%p163_p2) target bundleno = 772 (0x304), region = 36  ;;  %252 = vrot.lane.b32.xlu1 (!%p163_p2), %v1344_v0, %s1345_s17  ;;  %519 = vmatprep.mubr.f32.mxu0 (!%p163_p2), %v1344_v0  ;;  %s1346_s22 = smov (!%p163_p2), 16   ;;  %vm258_vm0 = vcmask (!%p163_p2), 138240   ;;  %vm279_vm2 = vcmask (!%p163_p2), 130048   ;;  %vm323_vm4 = vcmask (!%p163_p2), 7168   ;;  %vm1354_vm5 = vmmov (!%p163_p2), 1  }
   0x7   : > { %s1347_s23 = smov (!%p163_p2), 1   ;;  %s1348_s24 = smov (!%p163_p2), 15   ;;  %1214 = vset.pattern.permute.xlu1 (!%p163_p2), %v1353_v6  ;;  %1215 = vset.pattern.permute.xlu0 (!%p163_p2), %v1353_v6  ;;  %v199_v10 = vand.u32 (!%p163_p2), 127, %v198_v8  ;;  %vm302_vm7 = vcmask (!%p163_p2), 121856   ;;  %vm348_vm13 = vcmask (!%p163_p2), 1039360   ;;  %vm390_vm14 = vcmask (!%p163_p2), 916480  }
   0x8   : > { %s1349_s25 = smov (!%p163_p2), 127   ;;  %s1350_s26 = smov (!%p163_p2), 112  }
   0x9   : > { %s1351_s27 = smov (!%p163_p2), 113   ;;  %s1352_s28 = smov (!%p163_p2), 111   ;;  %v200_v12 = vadd.s32 (!%p163_p2), 128, %v199_v10  ;;  %v205_v16 = vand.u32 (!%p163_p2), 15, %v199_v10  ;;  %v418_v10 = vld [vmem:[%s1682_s1] sm:$0xff] (!%p163_p2) }
   0xa   : > { %273 = vrot.lane.b32.xlu1 (!%p163_p2), %v1344_v0, %s1346_s22 }
   0xb   : > { %v212_v15 = vand.u32 (!%p163_p2), 15, %v200_v12  ;;  %vm1444_vm3 = vcmp.ge.s32.totalorder (!%p163_p2), %v205_v16, 1  ;;  %vm1473_vm10 = vcmp.le.s32.totalorder (!%p163_p2), %v205_v16, 14  ;;  %v419_v12 = vld [vmem:[%s1682_s1 + $0x8] sm:$0xff] (!%p163_p2) }
   0xc   : > { %vm1466_vm9 = vmpackc.low (!%p163_p2), %vm1354_vm5, %vm1444_vm3 }
   0xd   : > { %s1707_s16 = smov (!%p188_p3, %s1036_s16), 1  ;;  %vm1440_vm1 = vcmp.ge.s32.totalorder %v212_v15, 1  ;;  %vm1459_vm8 = vcmp.le.s32.totalorder %v212_v15, 14  ;;  %vm1098_vm12 = vmpackc.low %vm1444_vm3, %vm1473_vm10 }
   0xe   : > { %s1050_s18 = sshll.u32 %s1707_s16, 4  ;;  %vm1453_vm6 = vmpackc.low %vm1354_vm5, %vm1440_vm1 }
   0xf   : > { %s192_s21 = scalar_lea.vmem %s1681_s0, %s1050_s18  ;;  %vm1095_vm11 = vmpackc.low %vm1440_vm1, %vm1459_vm8 }
  0x10   : > { %v1401_v1 = vld [vmem:[%s192_s21] sm:$0xff]  ;;  %v1403_v2 = vld [vmem:[%s192_s21 + $0x8] sm:$0xff]  ;;  %vm1101_vm15 = vmpackc.low %vm1459_vm8, %vm1354_vm5 }
  0x11   : > { %v1179_v3 = vpack.i.bf16 %v1403_v2, %v1401_v1  ;;  %v1209_v4 = vpack.i.bf16 %v1344_v0, %v1403_v2 }
  0x13   : > { %1180 = vrot.lane.b32.xlu0 %v1179_v3, %s1345_s17  ;;  %1195 = vrot.lane.b32.xlu1 %v1179_v3, %s1347_s23 }
  0x17   : > { %1185 = vrot.lane.b32.xlu0 %v1179_v3, %s1346_s22  ;;  %317 = vrot.lane.b32.xlu1 %v1344_v0, %s1347_s23 }
  0x1b   : > { %1190 = vrot.lane.b32.xlu0 %v1179_v3, %s1348_s24  ;;  %342 = vrot.lane.b32.xlu1 %v1401_v1, %s1349_s25 }
  0x1f   : > { %296 = vrot.lane.b32.xlu0 %v1344_v0, %s1348_s24  ;;  %1210 = vrot.lane.b32.xlu1 %v1209_v4, %s1350_s26 }
  0x23   : > { %1200 = vrot.lane.b32.xlu0 %v1209_v4, %s1349_s25  ;;  %384 = vrot.lane.b32.xlu1 %v1401_v1, %s1350_s26 }
  0x27   : > { %1205 = vrot.lane.b32.xlu0 %v1209_v4, %s1351_s27  ;;  %407 = vrot.lane.b32.xlu1 %v1344_v0, %s1352_s28 }
  0x2b   : > { %363 = vrot.lane.b32.xlu0 %v1401_v1, %s1351_s27  ;;  %440 = vperm.xlu1 %1214, %v229_v5  }
  0x2f   : > { %405 = vrot.lane.b32.xlu0 %v1403_v2, %s1352_s28  ;;  %1222 = vrot.lane.b32.xlu1 %v1344_v0, %s1346_s22 }
  0x33   : > { %403 = vrot.lane.b32.xlu0 %v1401_v1, %s1352_s28 }
  0x37   : > { %445 = vperm.xlu0 %1215, %v230_v7  }
  0x3b   : > { %1217 = vrot.lane.b32.xlu0 %v1344_v0, %s1345_s17 }
  0x3f   : > { %1227 = vrot.lane.b32.xlu0 %v1344_v0, %s1348_s24 }
  0x78   : > { %v253_v9 = vpop.permute.xlu1 %252 }
  0x7c   : > { %v274_v11 = vpop.permute.xlu1 %273 }
  0x85   : > { %v1181_v13 = vpop.permute.xlu0 %1180  ;;  %v1196_v14 = vpop.permute.xlu1 %1195 }
  0x86   : > { %v1183_v17 = vunpack.i.h.bf16 %v1181_v13  ;;  %v1182_v18 = vunpack.i.l.bf16 %v1181_v13  ;;  %v1198_v25 = vunpack.i.h.bf16 %v1196_v14  ;;  %v1197_v26 = vunpack.i.l.bf16 %v1196_v14 }
  0x88   : > { %v260_v27 = vsel %vm258_vm0, %v1182_v18, %v1183_v17  ;;  %v259_v30 = vsel %vm258_vm0, %v253_v9, %v1182_v18  ;;  %v325_v38 = vsel %vm323_vm4, %v1197_v26, %v1198_v25 }
  0x89   : > { %v1186_v19 = vpop.permute.xlu0 %1185  ;;  %v318_v22 = vpop.permute.xlu1 %317 }
  0x8a   : > { %v1188_v23 = vunpack.i.h.bf16 %v1186_v19  ;;  %v1187_v24 = vunpack.i.l.bf16 %v1186_v19  ;;  %v324_v43 = vsel %vm323_vm4, %v318_v22, %v1197_v26 }
  0x8c   : > { %v281_v28 = vsel %vm279_vm2, %v1187_v24, %v1188_v23  ;;  %v280_v31 = vsel %vm279_vm2, %v274_v11, %v1187_v24 }
  0x8d   : > { %v1191_v32 = vpop.permute.xlu0 %1190  ;;  %v1088_v34 = vpack.c.bf16 %v281_v28, %v260_v27  ;;  %v1091_v35 = vpack.c.bf16 %v280_v31, %v259_v30  ;;  %v343_v37 = vpop.permute.xlu1 %342 }
  0x8e   : > { %v1193_v39 = vunpack.i.h.bf16 %v1191_v32  ;;  %v1192_v40 = vunpack.i.l.bf16 %v1191_v32 }
  0x8f   : > { %1090 = vmatprep.subr.msk.bf16.mxu0 %vm1453_vm6, %v1088_v34 }
  0x90   : > { %v304_v42 = vsel %vm302_vm7, %v1192_v40, %v1193_v39  ;;  %1093 = vmatpush1.bf16.msk.msra.mxu0 %vm1466_vm9, %v1091_v35 }
  0x91   : > { %v1094_v44 = vpack.c.bf16 %v325_v38, %v304_v42  ;;  %v297_v45 = vpop.permute.xlu0 %296  ;;  %v1211_v48 = vpop.permute.xlu1 %1210 }
  0x92   : > { %v303_v46 = vsel %vm302_vm7, %v297_v45, %v1192_v40  ;;  %v1213_v52 = vunpack.i.h.bf16 %v1211_v48  ;;  %v1212_v53 = vunpack.i.l.bf16 %v1211_v48 }
  0x93   : > { %v1097_v47 = vpack.c.bf16 %v324_v43, %v303_v46  ;;  %1096 = vmatprep.subr.msk.bf16.mxu0 %vm1095_vm11, %v1094_v44  ;;  %vm369_vm11 = vcmask 924672  }
  0x94   : > { %v392_v60 = vsel %vm390_vm14, %v1212_v53, %v1213_v52 }
  0x95   : > { %v1201_v49 = vpop.permute.xlu0 %1200  ;;  %1099 = vmatpush1.bf16.msk.msra.mxu0 %vm1098_vm12, %v1097_v47  ;;  %vm1104_vm12 = vmpackc.low %vm1473_vm10, %vm1354_vm5  ;;  %v385_v59 = vpop.permute.xlu1 %384  ;;  %vm409_vm5 = vcmask 908288  }
  0x96   : > { %v1203_v50 = vunpack.i.h.bf16 %v1201_v49  ;;  %v1202_v51 = vunpack.i.l.bf16 %v1201_v49  ;;  %v391_v3 = vsel %vm390_vm14, %v385_v59, %v1212_v53 }
  0x98   : > { %v349_v54 = vsel %vm348_vm13, %v343_v37, %v1202_v51  ;;  %v350_v55 = vsel %vm348_vm13, %v1202_v51, %v1203_v50  ;;  %v231_v37 = vld [vmem:[%s1684_s3 + $0x10] sm:$0xff] }
  0x99   : > { %v1100_v56 = vpack.c.bf16 %v350_v55, %v1403_v2  ;;  %v1103_v57 = vpack.c.bf16 %v349_v54, %v1401_v1  ;;  %v1206_v58 = vpop.permute.xlu0 %1205  ;;  %v408_v6 = vpop.permute.xlu1 %407 }
  0x9a   : > { %v1208_v61 = vunpack.i.h.bf16 %v1206_v58  ;;  %v1207_v62 = vunpack.i.l.bf16 %v1206_v58 }
  0x9b   : > { %1102 = vmatprep.subr.msk.bf16.mxu0 %vm1101_vm15, %v1100_v56  ;;  %vm448_vm15 = vcmask 588800  }
  0x9c   : > { %v371_v63 = vsel %vm369_vm11, %v1207_v62, %v1208_v61  ;;  %1105 = vmatpush1.bf16.msk.msra.mxu0 %vm1104_vm12, %v1103_v57 }
  0x9d   : > { %v1106_v2 = vpack.c.bf16 %v392_v60, %v371_v63  ;;  %v364_v4 = vpop.permute.xlu0 %363 }
  0x9e   : > { %v370_v1 = vsel %vm369_vm11, %v364_v4, %v1207_v62 }
  0x9f   : > { %v1109_v5 = vpack.c.bf16 %v391_v3, %v370_v1  ;;  %1108 = vmatprep.subr.msk.bf16.mxu0 %vm1453_vm6, %v1106_v2  ;;  %vm1584_vm6 = vmpackc.low %vm1440_vm1, %vm1440_vm1 }
  0xa0   : > { %vm1620_vm1 = vmpackc.low %vm1473_vm10, %vm1473_vm10 }
  0xa1   : > { %v406_v7 = vpop.permute.xlu0 %405  ;;  %1111 = vmatpush1.bf16.msk.msra.mxu0 %vm1466_vm9, %v1109_v5  ;;  %vm1594_vm9 = vmpackc.low %vm1444_vm3, %vm1444_vm3 }
  0xa2   : > { %v411_v8 = vsel %vm409_vm5, %v406_v7, %v408_v6 }
  0xa3   : > { %1062 = vmatprep.subr.msk.mxu0 %vm1459_vm8, %v411_v8 }
  0xa5   : > { %v404_v9 = vpop.permute.xlu0 %403 }
  0xa6   : > { %v410_v11 = vsel %vm409_vm5, %v404_v9, %v406_v7 }
  0xa7   : > { %1063 = vmatpush1.msk.msra.mxu0 %vm1473_vm10, %v410_v11 }
  0xa8   : > { %1045 = vmatmul.mubr.msk.f32.vlgmr.msra.gmra.mrb[0].mxu0 %vm448_vm15, %v418_v10 }
  0xa9   : > { %525 = vmatprep.mubr.f32.mxu0 %v1344_v0 }
  0xaa   : > { %v441_v13 = vpop.permute.xlu1 %440 }
  0xac   : > { %1046 = vmatmul.mubr.msk.f32.gmra.mrb[2].mxu0 %vm448_vm15, %v419_v12 }
  0xae   : > { %v1223_v39 = vpop.permute.xlu1 %1222 }
  0xaf   : > { %v1225_v2 = vunpack.i.h.bf16 %v1223_v39  ;;  %v1224_v4 = vunpack.i.l.bf16 %v1223_v39 }
  0xb6   : > { %v446_v18 = vpop.permute.xlu0 %445 }
  0xba   : > { %v1218_v38 = vpop.permute.xlu0 %1217 }
  0xbb   : > { %v1219_v46 = vunpack.i.l.bf16 %v1218_v38  ;;  %v1220_v55 = vunpack.i.h.bf16 %v1218_v38 }
  0xbe   : > { %v1228_v40 = vpop.permute.xlu0 %1227 }
  0xbf   : > { %v1229_v8 = vunpack.i.l.bf16 %v1228_v40 }
 0x17b   : > { %v521_v14 = vpop.f32.mrb[0].mxu0 }
 0x17c   : > { %v522_v15 = vadd.f32 %v521_v14, %v441_v13  ;;  %v523_v16 = vpop.f32.mrb[1].mxu0 }
 0x17d   : > { %v524_v17 = vadd.f32 %v523_v16, %v441_v13 }
 0x17e   : > { %v1525_v19 = vmax.f32 %v522_v15, 0.0 }
 0x17f   : > { %v1527_v22 = vmax.f32 %v524_v17, 0.0  ;;  %v527_v23 = vpop.f32.mrb[2].mxu0 }
 0x180   : > { %v528_v24 = vadd.f32 %v527_v23, %v446_v18  ;;  %v529_v25 = vpop.f32.mrb[3].mxu0  ;;  %v1230_v23 = vunpack.i.h.bf16 %v1228_v40 }
 0x181   : > { %v530_v26 = vadd.f32 %v529_v25, %v446_v18  ;;  %v1241_v27 = vpack.i.bf16 %v1527_v22, %v1525_v19  ;;  %v1271_v35 = vpack.i.bf16 %v1344_v0, %v1527_v22 }
 0x182   : > { %v1531_v28 = vmax.f32 %v528_v24, 0.0 }
 0x183   : > { %v1533_v29 = vmax.f32 %v530_v26, 0.0  ;;  %1242 = vrot.lane.b32.xlu0 %v1241_v27, %s1348_s24  ;;  %1232 = vrot.lane.b32.xlu1 %v1241_v27, %s1345_s17 }
 0x184   : > { %v1281_v30 = vpack.i.bf16 %v1531_v28, %v1525_v19  ;;  %v1136_v34 = vpack.c.bf16 %v1531_v28, %v1525_v19 }
 0x185   : > { %v1256_v31 = vpack.i.bf16 %v1533_v29, %v1531_v28  ;;  %v1134_v32 = vpack.c.bf16 %v1533_v29, %v1527_v22  ;;  %v1306_v36 = vpack.i.bf16 %v1344_v0, %v1533_v29 }
 0x187   : > { %1257 = vrot.lane.b32.xlu0 %v1256_v31, %s1346_s22  ;;  %1237 = vrot.lane.b32.xlu1 %v1241_v27, %s1346_s22  ;;  %s197_s22 = scalar_lea.vmem %s1685_s4, %s1050_s18 }
 0x18b   : > { %1272 = vrot.lane.b32.xlu0 %v1271_v35, %s1349_s25  ;;  %1247 = vrot.lane.b32.xlu1 %v1256_v31, %s1345_s17 }
 0x18f   : > { %1277 = vrot.lane.b32.xlu0 %v1256_v31, %s1347_s23  ;;  %1252 = vrot.lane.b32.xlu1 %v1241_v27, %s1347_s23 }
 0x193   : > { %1282 = vrot.lane.b32.xlu0 %v1281_v30, %s1349_s25  ;;  %1262 = vrot.lane.b32.xlu1 %v1256_v31, %s1348_s24 }
 0x197   : > { %1302 = vrot.lane.b32.xlu0 %v1271_v35, %s1350_s26  ;;  %1267 = vrot.lane.b32.xlu1 %v1344_v0, %s1347_s23  ;;  %v861_v0 = vld [vmem:[%s1683_s2 + $0x8] sm:$0xff] }
 0x198   : > { %1047 = vmatprep.mubr.msk.f32.mxu1 %vm279_vm2, %v861_v0 }
 0x19b   : > { %1307 = vrot.lane.b32.xlu0 %v1306_v36, %s1351_s27  ;;  %1287 = vrot.lane.b32.xlu1 %v1271_v35, %s1351_s27 }
 0x19f   : > { %1312 = vrot.lane.b32.xlu0 %v1281_v30, %s1350_s26  ;;  %1292 = vrot.lane.b32.xlu1 %v1306_v36, %s1349_s25 }
 0x1a3   : > { %1327 = vrot.lane.b32.xlu0 %v1306_v36, %s1352_s28  ;;  %1297 = vrot.lane.b32.xlu1 %v1281_v30, %s1351_s27 }
 0x1a7   : > { %900 = vperm.xlu0 %1215, %v231_v37   ;;  %1317 = vrot.lane.b32.xlu1 %v1306_v36, %s1350_s26 }
 0x1ab   : > { %1322 = vrot.lane.b32.xlu1 %v1271_v35, %s1352_s28 }
 0x1af   : > { %1332 = vrot.lane.b32.xlu1 %v1281_v30, %s1352_s28 }
 0x1f5   : > { %v1243_v42 = vpop.permute.xlu0 %1242  ;;  %v1233_v43 = vpop.permute.xlu1 %1232 }
 0x1f6   : > { %v1235_v47 = vunpack.i.h.bf16 %v1233_v43  ;;  %v1234_v48 = vunpack.i.l.bf16 %v1233_v43  ;;  %v1245_v9 = vunpack.i.h.bf16 %v1243_v42  ;;  %v1244_v10 = vunpack.i.l.bf16 %v1243_v42 }
 0x1f8   : > { %v565_v58 = vsel %vm258_vm0, %v1234_v48, %v1235_v47  ;;  %v564_v59 = vsel %vm258_vm0, %v1219_v46, %v1234_v48  ;;  %v640_v27 = vsel %vm302_vm7, %v1229_v8, %v1244_v10  ;;  %v641_v30 = vsel %vm302_vm7, %v1244_v10, %v1245_v9 }
 0x1f9   : > { %v1258_v44 = vpop.permute.xlu0 %1257  ;;  %v1238_v45 = vpop.permute.xlu1 %1237 }
 0x1fa   : > { %v1260_v49 = vunpack.i.h.bf16 %v1258_v44  ;;  %v1259_v50 = vunpack.i.l.bf16 %v1258_v44  ;;  %v1240_v51 = vunpack.i.h.bf16 %v1238_v45  ;;  %v1239_v52 = vunpack.i.l.bf16 %v1238_v45 }
 0x1fc   : > { %v605_v63 = vsel %vm279_vm2, %v1239_v52, %v1240_v51  ;;  %v607_v3 = vsel %vm279_vm2, %v1259_v50, %v1260_v49  ;;  %v604_v12 = vsel %vm279_vm2, %v1224_v4, %v1239_v52  ;;  %v606_v13 = vsel %vm279_vm2, %v1225_v2, %v1259_v50 }
 0x1fd   : > { %v1576_v53 = vpop.permute.xlu0 %1272  ;;  %v1248_v54 = vpop.permute.xlu1 %1247  ;;  %v1118_v11 = vpack.c.bf16 %v607_v3, %v605_v63  ;;  %v1120_v26 = vpack.c.bf16 %v606_v13, %v604_v12 }
 0x1fe   : > { %v1250_v56 = vunpack.i.h.bf16 %v1248_v54  ;;  %v1249_v57 = vunpack.i.l.bf16 %v1248_v54  ;;  %v1275_v50 = vunpack.i.h.bf16 %v1576_v53  ;;  %v1274_v51 = vunpack.i.l.bf16 %v1576_v53 }
 0x200   : > { %v567_v60 = vsel %vm258_vm0, %v1249_v57, %v1250_v56  ;;  %v566_v62 = vsel %vm258_vm0, %v1220_v55, %v1249_v57  ;;  %vm1613_vm0 = vmpackc.low %vm1459_vm8, %vm1459_vm8  ;;  %v729_v63 = vsel %vm348_vm13, %v1274_v51, %v1275_v50 }
 0x201   : > { %v1278_v1 = vpop.permute.xlu0 %1277  ;;  %v1253_v5 = vpop.permute.xlu1 %1252  ;;  %v1112_v6 = vpack.c.bf16 %v567_v60, %v565_v58  ;;  %v1115_v7 = vpack.c.bf16 %v566_v62, %v564_v59 }
 0x202   : > { %v1280_v14 = vunpack.i.h.bf16 %v1278_v1  ;;  %v1279_v15 = vunpack.i.l.bf16 %v1278_v1  ;;  %v1255_v16 = vunpack.i.h.bf16 %v1253_v5  ;;  %v1254_v21 = vunpack.i.l.bf16 %v1253_v5 }
 0x203   : > { %1114 = vmatprep.subr.msk.bf16.mxu1 %vm1584_vm6, %v1112_v6 }
 0x204   : > { %1117 = vmatpush1.bf16.msk.msra.mxu1 %vm1594_vm9, %v1115_v7  ;;  %v683_v31 = vsel %vm323_vm4, %v1279_v15, %v1280_v14  ;;  %v681_v35 = vsel %vm323_vm4, %v1254_v21, %v1255_v16 }
 0x205   : > { %v1283_v17 = vpop.permute.xlu0 %1282  ;;  %v1263_v18 = vpop.permute.xlu1 %1262  ;;  %1119 = vmatprep.subr.bf16.mxu1 %v1118_v11  ;;  %v1128_v46 = vpack.c.bf16 %v683_v31, %v681_v35 }
 0x206   : > { %v1265_v24 = vunpack.i.h.bf16 %v1263_v18  ;;  %v1264_v25 = vunpack.i.l.bf16 %v1263_v18  ;;  %v1284_v52 = vunpack.i.l.bf16 %v1283_v17  ;;  %v1285_v59 = vunpack.i.h.bf16 %v1283_v17 }
 0x208   : > { %v642_v36 = vsel %vm302_vm7, %v1230_v23, %v1264_v25  ;;  %v643_v37 = vsel %vm302_vm7, %v1264_v25, %v1265_v24  ;;  %1121 = vmatpush1.bf16.msra.mxu1 %v1120_v26  ;;  %v728_v53 = vsel %vm348_vm13, %v1284_v52, %v1274_v51 }
 0x209   : > { %v1122_v38 = vpack.c.bf16 %v643_v37, %v641_v30  ;;  %v1125_v39 = vpack.c.bf16 %v642_v36, %v640_v27  ;;  %v1303_v40 = vpop.permute.xlu0 %1302  ;;  %v1268_v42 = vpop.permute.xlu1 %1267 }
 0x20a   : > { %v1270_v44 = vunpack.i.h.bf16 %v1268_v42  ;;  %v1269_v45 = vunpack.i.l.bf16 %v1268_v42  ;;  %v1305_v8 = vunpack.i.h.bf16 %v1303_v40  ;;  %v1304_v9 = vunpack.i.l.bf16 %v1303_v40 }
 0x20b   : > { %1124 = vmatprep.subr.msk.bf16.mxu1 %vm1613_vm0, %v1122_v38 }
 0x20c   : > { %v682_v33 = vsel %vm323_vm4, %v1270_v44, %v1279_v15  ;;  %v680_v47 = vsel %vm323_vm4, %v1269_v45, %v1254_v21  ;;  %1127 = vmatpush1.bf16.msk.msra.mxu1 %vm1620_vm1, %v1125_v39  ;;  %v809_v21 = vsel %vm390_vm14, %v1304_v9, %v1305_v8  ;;  %v860_v45 = vld [vmem:[%s1683_s2] sm:$0xff] }
 0x20d   : > { %v1131_v48 = vpack.c.bf16 %v682_v33, %v680_v47  ;;  %v1308_v41 = vpop.permute.xlu0 %1307  ;;  %v1288_v49 = vpop.permute.xlu1 %1287  ;;  %1130 = vmatprep.subr.msk.bf16.mxu1 %vm1584_vm6, %v1128_v46 }
 0x20e   : > { %v1310_v54 = vunpack.i.h.bf16 %v1308_v41  ;;  %v1309_v55 = vunpack.i.l.bf16 %v1308_v41  ;;  %v1290_v56 = vunpack.i.h.bf16 %v1288_v49  ;;  %v1289_v57 = vunpack.i.l.bf16 %v1288_v49 }
 0x210   : > { %1133 = vmatpush1.bf16.msk.msra.mxu1 %vm1594_vm9, %v1131_v48  ;;  %v771_v2 = vsel %vm369_vm11, %v1309_v55, %v1310_v54  ;;  %v769_v4 = vsel %vm369_vm11, %v1289_v57, %v1290_v56 }
 0x211   : > { %v1293_v58 = vpop.permute.xlu1 %1292  ;;  %1135 = vmatprep.subr.bf16.mxu1 %v1134_v32  ;;  %v1313_v3 = vpop.permute.xlu0 %1312  ;;  %v1144_v10 = vpack.c.bf16 %v771_v2, %v769_v4 }
 0x212   : > { %v1295_v60 = vunpack.i.h.bf16 %v1293_v58  ;;  %v1294_v62 = vunpack.i.l.bf16 %v1293_v58  ;;  %v1314_v11 = vunpack.i.l.bf16 %v1313_v3  ;;  %v1315_v14 = vunpack.i.h.bf16 %v1313_v3 }
 0x214   : > { %v730_v1 = vsel %vm348_vm13, %v1285_v59, %v1294_v62  ;;  %v731_v5 = vsel %vm348_vm13, %v1294_v62, %v1295_v60  ;;  %1137 = vmatpush1.bf16.msra.mxu1 %v1136_v34  ;;  %v808_v17 = vsel %vm390_vm14, %v1314_v11, %v1304_v9 }
 0x215   : > { %v1138_v22 = vpack.c.bf16 %v731_v5, %v729_v63  ;;  %v1141_v29 = vpack.c.bf16 %v730_v1, %v728_v53  ;;  %v1298_v32 = vpop.permute.xlu1 %1297  ;;  %v1328_v19 = vpop.permute.xlu0 %1327 }
 0x216   : > { %v1300_v6 = vunpack.i.h.bf16 %v1298_v32  ;;  %v1299_v7 = vunpack.i.l.bf16 %v1298_v32  ;;  %v1330_v18 = vunpack.i.h.bf16 %v1328_v19  ;;  %v1329_v23 = vunpack.i.l.bf16 %v1328_v19 }
 0x217   : > { %1140 = vmatprep.subr.msk.bf16.mxu1 %vm1613_vm0, %v1138_v22 }
 0x218   : > { %v770_v12 = vsel %vm369_vm11, %v1300_v6, %v1309_v55  ;;  %v768_v13 = vsel %vm369_vm11, %v1299_v7, %v1289_v57  ;;  %1143 = vmatpush1.bf16.msk.msra.mxu1 %vm1620_vm1, %v1141_v29  ;;  %v847_v35 = vsel %vm409_vm5, %v1329_v23, %v1330_v18 }
 0x219   : > { %v1147_v28 = vpack.c.bf16 %v770_v12, %v768_v13  ;;  %v1318_v34 = vpop.permute.xlu1 %1317  ;;  %1146 = vmatprep.subr.msk.bf16.mxu1 %vm1584_vm6, %v1144_v10 }
 0x21a   : > { %v1320_v15 = vunpack.i.h.bf16 %v1318_v34  ;;  %v1319_v16 = vunpack.i.l.bf16 %v1318_v34 }
 0x21c   : > { %1149 = vmatpush1.bf16.msk.msra.mxu1 %vm1594_vm9, %v1147_v28  ;;  %v811_v24 = vsel %vm390_vm14, %v1319_v16, %v1320_v15  ;;  %v810_v25 = vsel %vm390_vm14, %v1315_v14, %v1319_v16 }
 0x21d   : > { %v1323_v26 = vpop.permute.xlu1 %1322  ;;  %v1150_v27 = vpack.c.bf16 %v811_v24, %v809_v21  ;;  %v1152_v61 = vpack.c.bf16 %v810_v25, %v808_v17 }
 0x21e   : > { %v1325_v30 = vunpack.i.h.bf16 %v1323_v26  ;;  %v1324_v31 = vunpack.i.l.bf16 %v1323_v26 }
 0x21f   : > { %1151 = vmatprep.subr.bf16.mxu1 %v1150_v27 }
 0x220   : > { %v845_v36 = vsel %vm409_vm5, %v1324_v31, %v1325_v30  ;;  %1153 = vmatpush1.bf16.msra.mxu1 %v1152_v61 }
 0x221   : > { %v1154_v37 = vpack.c.bf16 %v847_v35, %v845_v36  ;;  %v1333_v38 = vpop.permute.xlu1 %1332 }
 0x222   : > { %v1335_v20 = vunpack.i.h.bf16 %v1333_v38  ;;  %v1334_v39 = vunpack.i.l.bf16 %v1333_v38 }
 0x223   : > { %1156 = vmatprep.subr.msk.bf16.mxu1 %vm1613_vm0, %v1154_v37 }
 0x224   : > { %v846_v40 = vsel %vm409_vm5, %v1335_v20, %v1329_v23  ;;  %v844_v42 = vsel %vm409_vm5, %v1334_v39, %v1324_v31 }
 0x225   : > { %v1157_v44 = vpack.c.bf16 %v846_v40, %v844_v42 }
 0x226   : > { %v901_v46 = vpop.permute.xlu0 %900 }
 0x227   : > { %1159 = vmatpush1.bf16.msk.msra.mxu1 %vm1620_vm1, %v1157_v44 }
 0x22a   : > { %971 = vmatmul.mubr.f32.vlgmr.msra.gmra.mrb[0].mxu1 %v860_v45 }
 0x2fd   : > { %v972_v33 = vpop.f32.mrb[0].mxu1 }
 0x2fe   : > { %v973_v47 = vadd.f32 %v972_v33, %v901_v46  ;;  %v974_v48 = vpop.f32.mrb[1].mxu1 }
 0x2ff   : > { %v975_v0 = vadd.f32 %v974_v48, %v901_v46 }
 0x300   : > { %v977_v41 = vmax.f32 %v973_v47, 0.0 }
 0x301   : > { %v978_v49 = vmax.f32 %v975_v0, 0.0 }
 0x302   : > { %979 = vst [vmem:[%s197_s22] sm:$0xff] %v977_v41 }
 0x303   : > { %980 = vst [vmem:[%s197_s22 + $0x8] sm:$0xff] %v978_v49 }
 0x304 PF: > { %s14_s15 = sadd.s32 1, %s1342_s15  }
 0x305   : > { %p11_p4 = scmp.ge.s32.totalorder %s14_s15, 4  }
 0x307   :  { %13 = sbr.rel (!%p11_p4) target bundleno = 1 (0x1), region = 66 }

</bundles_post_ra>
